<compile_context>
chip_gen: v7x
topology: tpu7x:2x2x1
jax: 0.10.0
libtpu: 0.0.40
codegen_flags: <defaults>
</compile_context>

<pallas_src>
import functools

import jax
import jax.numpy as jnp
from jax.experimental import pallas as pl
from jax.experimental.pallas import tpu as pltpu


# --------------------------------------------------------------------------------------
# Kernels
# --------------------------------------------------------------------------------------

def _batchnorm_fused_kernel(x_ref, gamma_ref, beta_ref, o_ref, *, eps, inv_n):
    # x_ref: (N, Cb, T) -- full batch per block; gamma_ref/beta_ref: (Cb, 1)
    x = x_ref[...].astype(jnp.float32)
    g = gamma_ref[...].astype(jnp.float32)[None]          # (1, Cb, 1)
    b = beta_ref[...].astype(jnp.float32)[None]           # (1, Cb, 1)

    mean = jnp.sum(x, axis=0, keepdims=True) * inv_n       # (1, Cb, T)
    var = jnp.sum(jnp.square(x - mean), axis=0, keepdims=True) * inv_n
    inv_std = jax.lax.rsqrt(var + eps)
    scale = inv_std * g                                     # (1, Cb, T)
    shift = b - mean * scale                                # (1, Cb, T)
    # One multiply-add per element; no (x - mean) temporary on the output path.
    o_ref[...] = (x * scale + shift).astype(o_ref.dtype)


def _sum_kernel(x_ref, s_ref):
    # Accumulate sum over batch chunks; grid axis 2 ("arbitrary") walks the N chunks.
    @pl.when(pl.program_id(2) == 0)
    def _():
        s_ref[...] = jnp.zeros_like(s_ref)
    s_ref[...] += jnp.sum(x_ref[...].astype(jnp.float32), axis=0)


def _sqdiff_kernel(x_ref, mean_ref, s_ref):
    # Accumulate sum((x - mean)^2) over batch chunks (true two-pass variance).
    @pl.when(pl.program_id(2) == 0)
    def _():
        s_ref[...] = jnp.zeros_like(s_ref)
    d = x_ref[...].astype(jnp.float32) - mean_ref[...][None]
    s_ref[...] += jnp.sum(d * d, axis=0)


def _apply_kernel(x_ref, scale_ref, shift_ref, o_ref):
    x = x_ref[...].astype(jnp.float32)
    o_ref[...] = (x * scale_ref[...][None] + shift_ref[...][None]).astype(o_ref.dtype)


# --------------------------------------------------------------------------------------
# Block / VMEM planning helpers
# --------------------------------------------------------------------------------------

def _padded_block_bytes(n_rows, cb, t):
    cb_pad = -(-cb // 8) * 8       # sublane padding
    t_pad = -(-t // 128) * 128     # lane padding
    return n_rows * cb_pad * t_pad * 4


def _vmem_capacity_bytes():
    try:
        info = pltpu.get_tpu_info()
        for attr in ("vmem_capacity_bytes", "vmem_size_bytes", "vmem_bytes"):
            v = getattr(info, attr, None)
            if v:
                return int(v)
    except Exception:
        pass
    return 64 << 20   # conservative default (v7x per-core VMEM)


def _vmem_limit(fp_bytes, limit_cap):
    return int(min(max(fp_bytes + (4 << 20), 16 << 20), limit_cap))


def _pick_block(n_rows, rows, cols, budget_bytes):
    """Pick a (row_block, col_block) obeying the (8,128) rules whose footprint
    (double-buffered in+out pipeline buffers plus ~2 blocks of in-kernel temporaries,
    i.e. 6x the padded block) fits `budget_bytes`.  Preference order: shardable grid
    (>= 2 steps), longest contiguous lane extent (full cols first), even grid for
    megacore balance, ~8 steps to hide pipeline ramp, then larger channel blocks.
    Returns (cb, t, footprint) or None if nothing fits."""
    if cols % 128 == 0:
        col_cands = [t for t in range(128, cols + 1, 128) if cols % t == 0]
    else:
        col_cands = [cols]            # full-extent block (sub-128 lanes; small arrays only)
    if rows % 8 == 0:
        row_cands = [c for c in range(8, rows + 1, 8) if rows % c == 0]
    else:
        row_cands = [rows]            # full-extent block along rows

    best_key, best = None, None
    for cb in row_cands:
        for t in col_cands:
            fp = 6 * _padded_block_bytes(n_rows, cb, t)
            if fp > budget_bytes:
                continue
            gtot = (rows // cb) * (cols // t)
            key = (gtot >= 2,                       # shardable across 2 TensorCores
                   t,                               # long contiguous DMA runs first
                   (gtot % 2 == 0) or (gtot == 1),  # even grid -> megacore load balance
                   min(gtot, 8),                    # enough steps to hide DMA ramp/drain
                   cb)
            if best_key is None or key > best_key:
                best_key, best = key, (cb, t, fp)
    return best


def _pick_split_blocks(N, rows, cols, budget_bytes):
    """Block plan for the batch-split fallback: per-batch-row (cb, t) tile plus the
    largest divisor-of-N chunk of batch rows that keeps the footprint within budget."""
    blk = _pick_block(1, rows, cols, budget_bytes // 2)
    if blk is None:
        cb = 8 if rows % 8 == 0 else rows
        t = 128 if cols % 128 == 0 else cols
    else:
        cb, t, _ = blk
    per_row = _padded_block_bytes(1, cb, t)
    max_chunk = max(1, budget_bytes // (8 * per_row))
    n_chunk = 1
    for d in range(1, min(N, max_chunk) + 1):
        if N % d == 0:
            n_chunk = d
    return n_chunk, cb, t


# --------------------------------------------------------------------------------------
# Drivers
# --------------------------------------------------------------------------------------

def _batchnorm_fused(x3, g_col, b_col, *, eps, cb, t, fp, limit_cap):
    N, rows, cols = x3.shape
    grid = (rows // cb, cols // t)
    nelem = int(N) * int(rows) * int(cols)
    cost = pl.CostEstimate(flops=6 * nelem,
                           transcendentals=int(rows) * int(cols),
                           bytes_accessed=2 * nelem * x3.dtype.itemsize + 8 * int(rows))
    return pl.pallas_call(
        functools.partial(_batchnorm_fused_kernel, eps=eps, inv_n=1.0 / N),
        out_shape=jax.ShapeDtypeStruct(x3.shape, x3.dtype),
        grid_spec=pltpu.PrefetchScalarGridSpec(
            num_scalar_prefetch=0,
            grid=grid,
            in_specs=[
                pl.BlockSpec((N, cb, t), lambda ci, hi: (0, ci, hi)),
                pl.BlockSpec((cb, 1), lambda ci, hi: (ci, 0)),
                pl.BlockSpec((cb, 1), lambda ci, hi: (ci, 0)),
            ],
            out_specs=pl.BlockSpec((N, cb, t), lambda ci, hi: (0, ci, hi)),
        ),
        compiler_params=pltpu.CompilerParams(
            dimension_semantics=("parallel", "parallel"),
            vmem_limit_bytes=_vmem_limit(fp, limit_cap),
        ),
        cost_estimate=cost,
    )(x3, g_col, b_col)


def _batchnorm_split(x3, g_col, b_col, *, eps, budget_bytes, limit_cap):
    """Batch-split path for when the full batch cannot sit in one VMEM block:
    (1) sum over N, (2) sum((x-mean)^2) over N, (3) apply y = x*scale + shift."""
    N, rows, cols = x3.shape
    n_chunk, cb, t = _pick_split_blocks(N, rows, cols, budget_bytes)
    n_steps = N // n_chunk
    fp = (6 * n_chunk + 8) * _padded_block_bytes(1, cb, t)
    vlim = _vmem_limit(fp, limit_cap)

    x_spec = pl.BlockSpec((n_chunk, cb, t), lambda ci, hi, ni: (ni, ci, hi))
    stat_spec = pl.BlockSpec((cb, t), lambda ci, hi, ni: (ci, hi))
    grid_stats = (rows // cb, cols // t, n_steps)
    stats_params = pltpu.CompilerParams(
        dimension_semantics=("parallel", "parallel", "arbitrary"),
        vmem_limit_bytes=vlim,
    )

    sums = pl.pallas_call(
        _sum_kernel,
        out_shape=jax.ShapeDtypeStruct((rows, cols), jnp.float32),
        grid_spec=pltpu.PrefetchScalarGridSpec(
            num_scalar_prefetch=0, grid=grid_stats,
            in_specs=[x_spec], out_specs=stat_spec),
        compiler_params=stats_params,
    )(x3)
    mean = sums * (1.0 / N)

    sqsum = pl.pallas_call(
        _sqdiff_kernel,
        out_shape=jax.ShapeDtypeStruct((rows, cols), jnp.float32),
        grid_spec=pltpu.PrefetchScalarGridSpec(
            num_scalar_prefetch=0, grid=grid_stats,
            in_specs=[x_spec, stat_spec], out_specs=stat_spec),
        compiler_params=stats_params,
    )(x3, mean)
    var = sqsum * (1.0 / N)

    # Tiny O(rows*cols) epilogue in plain JAX; the apply kernel is then a pure MAC.
    scale = jax.lax.rsqrt(var + eps) * g_col
    shift = b_col - mean * scale

    grid_apply = (n_steps, rows // cb, cols // t)
    return pl.pallas_call(
        _apply_kernel,
        out_shape=jax.ShapeDtypeStruct(x3.shape, x3.dtype),
        grid_spec=pltpu.PrefetchScalarGridSpec(
            num_scalar_prefetch=0, grid=grid_apply,
            in_specs=[
                pl.BlockSpec((n_chunk, cb, t), lambda ni, ci, hi: (ni, ci, hi)),
                pl.BlockSpec((cb, t), lambda ni, ci, hi: (ci, hi)),
                pl.BlockSpec((cb, t), lambda ni, ci, hi: (ci, hi)),
            ],
            out_specs=pl.BlockSpec((n_chunk, cb, t), lambda ni, ci, hi: (ni, ci, hi)),
        ),
        compiler_params=pltpu.CompilerParams(
            dimension_semantics=("parallel", "parallel", "parallel"),
            vmem_limit_bytes=vlim,
        ),
    )(x3, scale, shift)


def batchnorm_forward(x, gamma, beta, *, eps=1e-5,
                      vmem_block_budget_bytes=None,
                      force_batch_split=False):
    """x: (N, C, H, W) float32; gamma, beta: (C,). Returns (N, C, H, W)."""
    N, C, H, W = x.shape

    # Generation-aware VMEM budgeting: ~20 MiB block budget on 64 MiB-VMEM parts (v7x),
    # ~56 MiB on 128 MiB parts (v5e/v6e); footprint already accounts for temporaries.
    cap = _vmem_capacity_bytes()
    if vmem_block_budget_bytes is None:
        if cap >= (128 << 20):
            vmem_block_budget_bytes = 56 << 20
        else:
            vmem_block_budget_bytes = min(20 << 20, max(8 << 20, cap // 3))
    limit_cap = min((96 << 20) if cap >= (128 << 20) else (44 << 20),
                    max(cap * 3 // 4, 16 << 20))

    # Layout: rows -> sublanes, cols -> lanes.  For small/odd C with a lane-friendly W,
    # fold H into the row axis so sublanes are dense (gamma/beta repeat per H).
    if C % 8 != 0 and H > 1 and W % 128 == 0:
        rows, cols = C * H, W
        g_rows = jnp.repeat(gamma.astype(jnp.float32), H)
        b_rows = jnp.repeat(beta.astype(jnp.float32), H)
    else:
        rows, cols = C, H * W
        g_rows = gamma.astype(jnp.float32)
        b_rows = beta.astype(jnp.float32)
    x3 = x.reshape(N, rows, cols)
    g_col = g_rows.reshape(rows, 1)
    b_col = b_rows.reshape(rows, 1)

    # Pad the lane axis to a multiple of 128 (unmasked, lane-dense stores).  Padded
    # columns produce independent garbage stats/outputs and are sliced off below.
    cols_p = cols
    if cols % 128 != 0 and cols > 128:
        cols_p = -(-cols // 128) * 128
        x3 = jnp.pad(x3, ((0, 0), (0, 0), (0, cols_p - cols)))

    blk = _pick_block(N, rows, cols_p, vmem_block_budget_bytes)
    if force_batch_split or blk is None:
        y3 = _batchnorm_split(x3, g_col, b_col, eps=eps,
                              budget_bytes=vmem_block_budget_bytes,
                              limit_cap=limit_cap)
    else:
        cb, t, fp = blk
        y3 = _batchnorm_fused(x3, g_col, b_col, eps=eps, cb=cb, t=t,
                              fp=fp, limit_cap=limit_cap)

    return y3[:, :, :cols].reshape(N, C, H, W)


# --------------------------------------------------------------------------------------
# Reference + demo
# --------------------------------------------------------------------------------------

def _reference(x, gamma, beta, eps=1e-5):
    mean = jnp.mean(x, axis=0, keepdims=True)
    var = jnp.mean((x - mean) ** 2, axis=0, keepdims=True)
    xn = (x - mean) / jnp.sqrt(var + eps)
    return xn * gamma.reshape(1, -1, 1, 1) + beta.reshape(1, -1, 1, 1)


if __name__ == "__main__":
    key = jax.random.PRNGKey(0)
    N, C, H, W = 2, 4, 16, 16
    x = jax.random.normal(key, (N, C, H, W), dtype=jnp.float32)

    # Deterministic parameter init, matching the module's __init__:
    gamma = jnp.ones((C,), dtype=jnp.float32)
    beta = jnp.zeros((C,), dtype=jnp.float32)

    y_ref = _reference(x, gamma, beta, eps=1e-5)

    # Main (fused, full-batch-per-block) path.
    y = jax.block_until_ready(batchnorm_forward(x, gamma, beta, eps=1e-5))
    assert y.shape == (N, C, H, W)
    assert jnp.max(jnp.abs(y - y_ref)) < 1e-4, "fused path mismatch vs. pure-JAX reference"

    # Also exercise the batch-split fallback (used when full batch won't fit VMEM).
    y2 = jax.block_until_ready(
        batchnorm_forward(x, gamma, beta, eps=1e-5, force_batch_split=True))
    assert jnp.max(jnp.abs(y2 - y_ref)) < 1e-4, "split path mismatch vs. pure-JAX reference"

    print("KERNEL_OK")
</pallas_src>

<mosaic_0001>
module attributes {stable_mosaic.version = 11 : i64} {
  func.func @_batchnorm_fused_kernel(%arg0: i32, %arg1: i32, %arg2: memref<2x4x128xf32, #tpu.memory_space<vmem>>, %arg3: memref<4x1xf32, #tpu.memory_space<vmem>>, %arg4: memref<4x1xf32, #tpu.memory_space<vmem>>, %arg5: memref<2x4x128xf32, #tpu.memory_space<vmem>>) attributes {dimension_semantics = [#tpu.dimension_semantics<parallel>, #tpu.dimension_semantics<parallel>], iteration_bounds = array<i64: 1, 2>, scalar_prefetch = 0 : i64, scratch_operands = 0 : i64, tpu.core_type = #tpu.core_type<tc>, window_params = [{transform_indices = @transform_0, window_bounds = array<i64: 2, 4, 128>}, {transform_indices = @transform_1, window_bounds = array<i64: 4, 1>}, {transform_indices = @transform_2, window_bounds = array<i64: 4, 1>}, {transform_indices = @transform_3, window_bounds = array<i64: 2, 4, 128>}]} {
    %c0 = arith.constant 0 : index
    %c0_0 = arith.constant 0 : index
    %c0_1 = arith.constant 0 : index
    %0 = vector.load %arg2[%c0, %c0_0, %c0_1] : memref<2x4x128xf32, #tpu.memory_space<vmem>>, vector<2x4x128xf32>
    %c0_2 = arith.constant 0 : index
    %c0_3 = arith.constant 0 : index
    %1 = vector.load %arg3[%c0_2, %c0_3] : memref<4x1xf32, #tpu.memory_space<vmem>>, vector<4x1xf32>
    %2 = vector.shape_cast %1 : vector<4x1xf32> to vector<1x4x1xf32>
    %c0_4 = arith.constant 0 : index
    %c0_5 = arith.constant 0 : index
    %3 = vector.load %arg4[%c0_4, %c0_5] : memref<4x1xf32, #tpu.memory_space<vmem>>, vector<4x1xf32>
    %4 = vector.shape_cast %3 : vector<4x1xf32> to vector<1x4x1xf32>
    %cst = arith.constant dense<0.000000e+00> : vector<4x128xf32>
    %5 = vector.multi_reduction <add>, %0, %cst [0] : vector<2x4x128xf32> to vector<4x128xf32>
    %6 = vector.shape_cast %5 : vector<4x128xf32> to vector<1x4x128xf32>
    %cst_6 = arith.constant 5.000000e-01 : f32
    %7 = vector.broadcast %cst_6 : f32 to vector<1x4x128xf32>
    %8 = arith.mulf %6, %7 : vector<1x4x128xf32>
    %9 = vector.broadcast %8 : vector<1x4x128xf32> to vector<2x4x128xf32>
    %10 = arith.subf %0, %9 : vector<2x4x128xf32>
    %11 = arith.mulf %10, %10 : vector<2x4x128xf32>
    %cst_7 = arith.constant dense<0.000000e+00> : vector<4x128xf32>
    %12 = vector.multi_reduction <add>, %11, %cst_7 [0] : vector<2x4x128xf32> to vector<4x128xf32>
    %13 = vector.shape_cast %12 : vector<4x128xf32> to vector<1x4x128xf32>
    %cst_8 = arith.constant 5.000000e-01 : f32
    %14 = vector.broadcast %cst_8 : f32 to vector<1x4x128xf32>
    %15 = arith.mulf %13, %14 : vector<1x4x128xf32>
    %cst_9 = arith.constant 9.99999974E-6 : f32
    %16 = vector.broadcast %cst_9 : f32 to vector<1x4x128xf32>
    %17 = arith.addf %15, %16 : vector<1x4x128xf32>
    %18 = math.rsqrt %17 : vector<1x4x128xf32>
    %19 = vector.broadcast %2 : vector<1x4x1xf32> to vector<1x4x128xf32>
    %20 = arith.mulf %18, %19 : vector<1x4x128xf32>
    %21 = arith.mulf %8, %20 : vector<1x4x128xf32>
    %22 = vector.broadcast %4 : vector<1x4x1xf32> to vector<1x4x128xf32>
    %23 = arith.subf %22, %21 : vector<1x4x128xf32>
    %24 = vector.broadcast %20 : vector<1x4x128xf32> to vector<2x4x128xf32>
    %25 = arith.mulf %0, %24 : vector<2x4x128xf32>
    %26 = vector.broadcast %23 : vector<1x4x128xf32> to vector<2x4x128xf32>
    %27 = arith.addf %25, %26 : vector<2x4x128xf32>
    %c0_10 = arith.constant 0 : index
    %c0_11 = arith.constant 0 : index
    %c0_12 = arith.constant 0 : index
    %28 = vector.load %arg5[%c0_10, %c0_11, %c0_12] : memref<2x4x128xf32, #tpu.memory_space<vmem>>, vector<2x4x128xf32>
    tpu.vector_store %arg5[%c0_10, %c0_11, %c0_12], %27 {strides = array<i32>} : memref<2x4x128xf32, #tpu.memory_space<vmem>>, vector<2x4x128xf32>,
    return
  }
  func.func @transform_0(%arg0: i32, %arg1: i32) -> (i32, i32, i32) {
    %c0_i32 = arith.constant 0 : i32
    %c0_i32_0 = arith.constant 0 : i32
    return %c0_i32, %arg0, %arg1 : i32, i32, i32
  }
  func.func @transform_1(%arg0: i32, %arg1: i32) -> (i32, i32) {
    %c0_i32 = arith.constant 0 : i32
    %c0_i32_0 = arith.constant 0 : i32
    return %arg0, %c0_i32 : i32, i32
  }
  func.func @transform_2(%arg0: i32, %arg1: i32) -> (i32, i32) {
    %c0_i32 = arith.constant 0 : i32
    %c0_i32_0 = arith.constant 0 : i32
    return %arg0, %c0_i32 : i32, i32
  }
  func.func @transform_3(%arg0: i32, %arg1: i32) -> (i32, i32, i32) {
    %c0_i32 = arith.constant 0 : i32
    %c0_i32_0 = arith.constant 0 : i32
    return %c0_i32, %arg0, %arg1 : i32, i32, i32
  }
}

</mosaic_0001>

<bundles_post_ra>
// kernel: tpu_custom_call.1
= control target key start
LH: loop header
LB: loop body
LE: loop exit
PB: predicated region body
PF: predicated region fallthrough
CT: control target
= control target key end

     0   :  { %8 = vsyncpa [#allocation3], 0  ;;  %s821_s0 = inlined_call_operand.hbm [shape: f32[2,4,256], index: 0, kind: input, shape index: {}]   ;;  %s822_s1 = inlined_call_operand.vmem [shape: f32[4,1], index: 1, kind: input, shape index: {}]   ;;  %s823_s2 = inlined_call_operand.vmem [shape: f32[4,1], index: 2, kind: input, shape index: {}]   ;;  %s824_s3 = inlined_call_operand.hbm [shape: f32[2,4,256], index: 3, kind: output, shape index: {}]  }
   0x1   :  { %10 = vsyncpa [#allocation3 + $0x1], 0 }
   0x2   :  { %11 = vsyncpa [#allocation4], 0 }
   0x3   :  { %13 = vsyncpa [#allocation4 + $0x1], 0  ;;  %s638_s12 = smov 0   ;;  %s640_s13 = smov 0  }
   0x4   :  { %s642_s14 = smov 0   ;;  %s644_s15 = smov 0  }
   0x5   :  { %s646_s16 = smov 0   ;;  %s648_s17 = smov 0  }
   0x6 LB: > { %s408_s18 = sadd.s32 4294967295, %s607_s17   ;;  %s409_s19 = sadd.s32 4294967294, %s607_s17   ;;  %s607_s17 = sphi %s648_s17, %s19_s17   ;;  %s603_s16 = sphi %s646_s16, %s838_s16   ;;  %s599_s15 = sphi %s644_s15, %s837_s15   ;;  %s595_s14 = sphi %s642_s14, %s836_s14   ;;  %s591_s13 = sphi %s640_s13, %s835_s13   ;;  %s587_s12 = sphi %s638_s12, %s834_s12  }
   0x7   : > { %s28_s20 = sadd.s32 1, %s603_s16  ;;  %s40_s21 = sadd.s32 1, %s595_s14 }
   0x8   : > { %p29_p0 = scmp.ge.s32.totalorder %s28_s20, 2  ;;  %p47_p1 = scmp.ne.s32.totalorder %s595_s14, %s591_s13 }
   0x9   : > { %p48_p2 = scmp.eq.s32.totalorder %s607_s17, 0  ;;  %p53_p3 = scmp.ne.s32.totalorder %s591_s13, %s587_s12 }
   0xa   : > { %s840_s20 = smov (%p29_p0, %s28_s20), 0  ;;  %p54_p5 = scmp.eq.s32.totalorder %s408_s18, 0 }
   0xb   : > { %p679_p4 = por %p48_p2, %p47_p1  ;;  %s36_s23 = ssub.s32 %s603_s16, %s840_s20 }
   0xc   : > { %p131_p6 = scmp.eq.s32.totalorder %s408_s18, 1  ;;  %p38_p7 = scmp.eq.s32.totalorder %s36_s23, 0 }
   0xd   : > { %p685_p8 = por %p54_p5, %p53_p3  ;;  %p137_p10 = scmp.eq.s32.totalorder %s409_s19, 1 }
   0xe   : > { %p689_p9 = por %p131_p6, %p47_p1  ;;  %p435_p13 = scmp.lt.s32.totalorder %s607_s17, 2 }
   0xf   : > { %s694_s26 = scalar_select %p38_p7, %s595_s14, %s40_s21  }
  0x10   : > { %s828_s25 = scalar_select %p689_p9, 1, 0 }
  0x11   : > { %p696_p11 = por %p137_p10, %p53_p3  ;;  %s171_s28 = sand.u32 1, %s595_s14  }
  0x12   : > { %s414_s29 = sshll.u32 %s171_s28, 3  ;;  %s415_s30 = sshll.u32 %s603_s16, 6 }
  0x13   : > { %s829_s27 = scalar_select %p696_p11, 1, 0 }
  0x14   : > { %s707_s6 = scalar_lea.hbm %s821_s0, %s415_s30  ;;  %s175_s7 = scalar_lea.vmem [#allocation2], %s414_s29 }
  0x15   : > { %s183_s8 = sshll.u32 %s175_s7, 4  ;;  %p713_p0 = pnand %p435_p13, %p679_p4  ;;  %s709_s8 = int_to_ptr.vmem [resolvable:$true] %s183_s8 }
  0x16   : > { %s717_s10 = scalar_lea.sflag [#allocation3], %s171_s28  ;;  %s495_s11 = scalar_lea.hbm %s707_s6, 128 }
  0x17   : > { %p496_p1 = scmp.ne.s32.totalorder %s707_s6, %s495_s11  ;;  %p497_p2 = pneg %p713_p0 }
  0x18   : > { %s500_s21 = scalar_lea.hbm %s821_s0, 256  ;;  %p501_p4 = scmp.lt.u32.totalorder %s707_s6, %s821_s0 }
  0x19   : > { %p498_p3 = pnand %p497_p2, %p496_p1  ;;  %p502_p6 = scmp.lt.u32.totalorder %s500_s21, %s495_s11 }
  0x1a   : > { %p504_p10 = scmp.lt.u32.totalorder %s495_s11, %s707_s6 }
  0x1b   : > { %p499_p5 = pneg %p498_p3  ;;  %p503_p7 = por %p502_p6, %p501_p4 }
  0x1d   : > { %p505_p13 = por %p504_p10, %p503_p7 }
  0x1f   : > { %p506_p12 = pnand %p505_p13, %p499_p5 }
  0x21   : > { %509 = shalt.err (!%p506_p12)
}
  0x22   : > { %s510_s28 = scalar_lea.vmem %s709_s8, 128  ;;  %s609_s29 = smov [#allocation2]  }
  0x23   : > { %p511_p1 = scmp.ne.s32.totalorder %s709_s8, %s510_s28  ;;  %s515_s30 = sshll.u32 %s609_s29, 4  ;;  %s516_s30 = int_to_ptr.vmem [resolvable:$false] %s515_s30 }
  0x24   : > { %s517_s4 = scalar_lea.vmem %s516_s30, 256  ;;  %p518_p9 = scmp.lt.s32.totalorder %s709_s8, %s516_s30 }
  0x25   : > { %p513_p3 = pnand %p511_p1, %p497_p2  ;;  %p519_p4 = scmp.lt.s32.totalorder %s517_s4, %s510_s28 }
  0x27   : > { %p514_p11 = pneg %p513_p3  ;;  %p520_p6 = por %p519_p4, %p518_p9 }
  0x29   : > { %p521_p7 = pnand %p520_p6, %p514_p11 }
  0x2b   : > { %524 = shalt.err (!%p521_p7)
}
  0x2c   : > { %s610_s5 = smov 128   ;;  %s611_s7 = smov 64  }
  0x2d   : > { %s612_s11 = smov 4   ;;  %p416_p12 = scmp.ge.s32.totalorder %s607_s17, 1 }
  0x2e   : > { %430 = dma.hbm_to_vmem [thread:$0]  (!%p713_p0), %s707_s6, 128, %s709_s8, %s717_s10, %s610_s5, %s611_s7, %s612_s11  }
  0x2f   : > { %p191_p2 = scmp.lt.s32.totalorder %s607_s17, 3 }
  0x31   : > { %p192_p5 = pnand %p416_p12, %p191_p2 }
  0x32   : > { %s748_s18 = sand.u32 (!%p192_p5), 1, %s591_s13  }
  0x33   : > { %195 = sbr.rel (%p192_p5) target bundleno = 213 (0xd5), region = 32  ;;  %s417_s19 = sshll.u32 (!%p192_p5), %s748_s18, 3 }
  0x34   : > { %s198_s21 = scalar_lea.sflag (!%p192_p5), [#allocation3], %s748_s18  ;;  %s201_s22 = scalar_lea.vmem (!%p192_p5), [#allocation2], %s417_s19 }
  0x3a   : > { %578 = dma.done.wait (%p685_p8), %s198_s21, 128  }
  0x3b   : > { %580 = vsyncadd (%p685_p8), %s198_s21, 4294967168  ;;  %v613_v0 = vmov 0   ;;  %v242_v1 = vld [vmem:[%s822_s1] sm:$0xf]  ;;  %vm244_vm0 = vcmask 1043456   ;;  %s231_s24 = scalar_lea.vmem [#allocation5], %s417_s19 }
  0x3c   : > { %492 = vset.pattern.permute.xlu0 %v613_v0  ;;  %v243_v2 = vld [vmem:[%s823_s2] sm:$0xf]  ;;  %v241_v4 = vld [vmem:[%s201_s22 + $0x4] sm:$0xf]  ;;  %s293_s23 = sshll.u32 %s231_s24, 4  ;;  %s420_s28 = sshll.u32 %s599_s15, 6  ;;  %s767_s23 = int_to_ptr.vmem [resolvable:$true] %s293_s23 }
  0x3d   : > { %261 = vperm.xlu0 %492, %v242_v1   ;;  %v240_v3 = vld [vmem:[%s201_s22] sm:$0xf]  ;;  %v246_v6 = vsel %vm244_vm0, %v241_v4, 0.0  ;;  %s772_s4 = scalar_lea.hbm %s824_s3, %s420_s28  ;;  %s279_s5 = scalar_lea.sflag [#allocation4], %s748_s18 }
  0x3e   : > { %v245_v5 = vsel %vm244_vm0, %v240_v3, 0.0  ;;  %s525_s15 = scalar_lea.vmem %s767_s23, 128  ;;  %p831_p9 = scmp.ne.s32.totalorder %s828_s25, 0 }
  0x3f   : > { %v247_v7 = vadd.f32 %v246_v6, %v245_v5  ;;  %p526_p8 = scmp.ne.s32.totalorder %s767_s23, %s525_s15  ;;  %s614_s7 = smov [#allocation5]  }
  0x40   : > { %s529_s11 = sshll.u32 %s614_s7, 4  ;;  %s530_s11 = int_to_ptr.vmem [resolvable:$false] %s529_s11 }
  0x41   : > { %268 = vperm.xlu0 %492, %v243_v2   ;;  %v248_v8 = vmul.f32 0.5, %v247_v7  ;;  %p527_p11 = pnand %p526_p8, %p831_p9  ;;  %s531_s19 = scalar_lea.vmem %s530_s11, 256 }
  0x42   : > { %p532_p10 = scmp.lt.s32.totalorder %s767_s23, %s530_s11  ;;  %p533_p13 = scmp.lt.s32.totalorder %s531_s19, %s525_s15 }
  0x43   : > { %v249_v9 = vsub.f32 %v240_v3, %v248_v8  ;;  %v250_v10 = vsub.f32 %v241_v4, %v248_v8  ;;  %p528_p0 = pneg %p527_p11 }
  0x44   : > { %p534_p1 = por %p533_p13, %p532_p10 }
  0x45   : > { %v251_v11 = vmul.f32 %v249_v9, %v249_v9  ;;  %v252_v12 = vmul.f32 %v250_v10, %v250_v10 }
  0x46   : > { %p535_p3 = pnand %p534_p1, %p528_p0 }
  0x47   : > { %v253_v13 = vsel %vm244_vm0, %v251_v11, 0.0  ;;  %v254_v14 = vsel %vm244_vm0, %v252_v12, 0.0 }
  0x48   : > { %v255_v15 = vadd.f32 %v254_v14, %v253_v13 }
  0x4a   : > { %v256_v16 = vmul.f32 0.5, %v255_v15 }
  0x4c   : > { %v257_v17 = vadd.f32 1e-05, %v256_v16 }
  0x4e   : > { %493 = vrsqrt.f32 %v257_v17 }
  0x58   : > { %v494_v18 = vpop.eup %493 }
  0xbc   : > { %v262_v19 = vpop.permute.xlu0 %261 }
  0xbd   : > { %v264_v20 = vmul.f32 %v494_v18, %v262_v19 }
  0xbf   : > { %v265_v21 = vmul.f32 %v264_v20, %v248_v8  ;;  %v272_v24 = vmul.f32 %v264_v20, %v240_v3  ;;  %v273_v25 = vmul.f32 %v264_v20, %v241_v4 }
  0xc0   : > { %v269_v22 = vpop.permute.xlu0 %268 }
  0xc1   : > { %v271_v23 = vsub.f32 %v269_v22, %v265_v21 }
  0xc3   : > { %v274_v26 = vadd.f32 %v272_v24, %v271_v23  ;;  %v275_v27 = vadd.f32 %v273_v25, %v271_v23 }
  0xc5   : > { %276 = vst [vmem:[%s231_s24] sm:$0xf] %v274_v26  ;;  %277 = vst [vmem:[%s231_s24 + $0x4] sm:$0xf] %v275_v27 }
  0xc6   : > { %538 = shalt.err (!%p535_p3)
}
  0xc7   : > { %s539_s21 = scalar_lea.hbm %s772_s4, 128  ;;  %s543_s8 = scalar_lea.hbm %s824_s3, 256 }
  0xc8   : > { %p540_p4 = scmp.ne.s32.totalorder %s772_s4, %s539_s21  ;;  %p544_p12 = scmp.lt.u32.totalorder %s772_s4, %s824_s3 }
  0xc9   : > { %p545_p2 = scmp.lt.u32.totalorder %s543_s8, %s539_s21  ;;  %p547_p8 = scmp.lt.u32.totalorder %s539_s21, %s772_s4 }
  0xca   : > { %p541_p6 = pnand %p540_p4, %p831_p9 }
  0xcb   : > { %p546_p5 = por %p545_p2, %p544_p12 }
  0xcc   : > { %p542_p7 = pneg %p541_p6 }
  0xcd   : > { %p548_p11 = por %p547_p8, %p546_p5 }
  0xcf   : > { %p549_p0 = pnand %p548_p11, %p542_p7 }
  0xd1   : > { %552 = shalt.err (!%p549_p0)
}
  0xd2   : > { %s615_s24 = smov 64   ;;  %s616_s28 = smov 128  }
  0xd3   : > { %s617_s29 = smov 4  }
  0xd4   : > { %425 = dma.vmem_to_hbm [thread:$0]  (%p831_p9), %s767_s23, 128, %s772_s4, %s279_s5, %s615_s24, %s616_s28, %s617_s29  }
  0xd5 PF: > { %s308_s30 = sand.u32 1, %s587_s12   ;;  %p832_p10 = scmp.ne.s32.totalorder %s829_s27, 0 }
  0xd6   : > { %p833_p13 = scmp.ge.s32.totalorder %s607_s17, 2  ;;  %s309_s15 = scalar_lea.sflag [#allocation4], %s308_s30 }
  0xd8   : > { %p432_p1 = pnand %p833_p13, %p832_p10 }
  0xda   : > { %582 = dma.done.wait (!%p432_p1), %s309_s15, 128  }
  0xdb   : > { %584 = vsyncadd (!%p432_p1), %s309_s15, 4294967168  ;;  %s19_s17 = sadd.s32 1, %s607_s17   ;;  %s834_s12 = smov %s591_s13 }
  0xdc   : > { %p16_p3 = scmp.ge.s32.totalorder %s19_s17, 4   ;;  %s835_s13 = smov %s595_s14 }
  0xdd   : > { %s836_s14 = smov %s694_s26  ;;  %s837_s15 = smov %s603_s16 }
  0xde   : > { %s838_s16 = smov %s840_s20  ;;  %18 = sbr.rel (!%p16_p3) target bundleno = 6 (0x6), region = 83 }
  0xe5   :  { %314 = vsyncpa [#allocation3], 1 }
  0xe6   :  { %316 = vsyncpa [#allocation3 + $0x1], 1 }
  0xe7   :  { %317 = vsyncpa [#allocation4], 1 }
  0xe8   :  { %319 = vsyncpa [#allocation4 + $0x1], 1 }

</bundles_post_ra>
